<compile_context>
chip_gen: v7x
topology: tpu7x:2x2x1
jax: 0.10.0
libtpu: 0.0.40
codegen_flags: <defaults>
</compile_context>

<pallas_src>
import functools

import jax
import jax.numpy as jnp
from jax.experimental import pallas as pl
from jax.experimental.pallas import tpu as pltpu

EPS = 1e-10
_TARGET_TILE_BYTES = 4 << 20          # ~4 MiB x tiles (review: 2-4 MiB -> ~95% of HBM roofline)
_VMEM_LIMIT_BYTES = 32 * 1024 * 1024  # double-buffered in+out at 4 MiB tiles ~= 16-20 MiB < 32 MiB


def _round_up(a, b):
    return -(-a // b) * b


# --------------------------- pass 1: statistics ------------------------------
def _stats_kernel(x_ref, m_ref, oh_ref, o_ref, *, tm, tiles_per, valid_rows, needs_mask):
    c = pl.program_id(0)   # core split ("parallel")
    i = pl.program_id(1)   # row tiles ("arbitrary", accumulates into o_ref)

    @pl.when(i == 0)
    def _init():
        o_ref[...] = jnp.zeros_like(o_ref)

    x = x_ref[...].astype(jnp.float32)
    m = m_ref[...]

    if needs_mask:
        # Ragged last tile: zero rows past the end of the packed array so the
        # unmasked sum(x) and the mask matmul never see out-of-bounds garbage.
        start = (c * tiles_per + i) * tm
        rows_x = jax.lax.broadcasted_iota(jnp.int32, x.shape, 0) + start
        x = jnp.where(rows_x < valid_rows, x, 0.0)
        rows_m = jax.lax.broadcasted_iota(jnp.int32, m.shape, 0) + start
        m = jnp.where(rows_m < valid_rows, m, 0.0)

    # Group-mask expansion on the (otherwise idle) MXU: mex[r, l] = m[r, l // F].
    # Exact for any matmul precision since both operands are 0/1 valued.
    mex = jnp.dot(m, oh_ref[...], preferred_element_type=jnp.float32)
    mx = x * mex
    o_ref[0:1, :] += jnp.sum(x, axis=0, keepdims=True)       # sum(x)      (unmasked, as in PyTorch)
    o_ref[1:2, :] += jnp.sum(mx, axis=0, keepdims=True)      # sum(m*x)
    o_ref[2:3, :] += jnp.sum(mx * x, axis=0, keepdims=True)  # sum(m*x^2)


# --------------------- pass 2: normalize + affine + mask ---------------------
def _norm_kernel(x_ref, m_ref, oh_ref, sc_ref, bs_ref, o_ref):
    x = x_ref[...].astype(jnp.float32)
    mex = jnp.dot(m_ref[...], oh_ref[...], preferred_element_type=jnp.float32)  # MXU
    o_ref[...] = ((x * sc_ref[...] + bs_ref[...]) * mex).astype(o_ref.dtype)    # folded affine


def masked_batchnorm(x, mask, alpha, beta, eps=EPS):
    """x: [B, N, F]; mask: [B, N]; alpha, beta: [F]. Returns [B, N, F] in x.dtype."""
    B, N, F = x.shape
    M = B * N
    x_dtype = x.dtype
    itemsize = jnp.dtype(x_dtype).itemsize

    # Tiny scalar reduce in the wrapper (off the kernel path).
    mask_f = mask.astype(jnp.float32)
    mask_sum = jnp.sum(mask_f)

    # Lane-dense packing: fold g rows into the lane dim when F < 128.
    if F < 128 and 128 % F == 0:
        g = 128 // F
    else:
        g = 1
    L = g * F
    gp = max(8, _round_up(g, 8))   # sublane-padded group count (matmul K dim = 8/16/...)

    # Minimal row padding: only when M is not a multiple of g, or the packed
    # row count would be < 8.  Otherwise the packed views are free reshapes
    # (no extra HBM copy of x).
    M_pad = max(_round_up(M, g), 8 * g)
    x_flat = x.reshape(M, F)
    m_flat = mask_f.reshape(M)
    if M_pad != M:
        x_flat = jnp.pad(x_flat, ((0, M_pad - M), (0, 0)))
        m_flat = jnp.pad(m_flat, (0, M_pad - M))
    Mg = M_pad // g

    xp = x_flat.reshape(Mg, L)          # free row-major merge
    mp = m_flat.reshape(Mg, g)
    mp_pad = jnp.pad(mp, ((0, 0), (0, gp - g))) if gp != g else mp   # mask-sized, tiny
    # onehot[j, l] = 1 iff lane l belongs to group j (rows g..gp-1 are zero).
    onehot = (jnp.arange(L)[None, :] // F == jnp.arange(gp)[:, None]).astype(jnp.float32)

    # Row tiling: ~4 MiB x tiles, multiple of 128 rows, or a single full tile.
    tm = max(128, (_TARGET_TILE_BYTES // (L * itemsize)) // 128 * 128)
    if tm >= Mg:
        tm = Mg
        n_tiles = 1
    else:
        n_tiles = -(-Mg // tm)
    needs_mask = (Mg % tm) != 0
    # Megacore split for pass 1 (v7x): only when the tile count splits evenly.
    n_split = 2 if (n_tiles >= 2 and n_tiles % 2 == 0) else 1
    tiles_per = n_tiles // n_split
    R = 8  # stats rows per core (3 used, padded to a sublane group)

    # ---- pass 1: per-lane partial sums, accumulator resident across grid ----
    stats_raw = pl.pallas_call(
        functools.partial(_stats_kernel, tm=tm, tiles_per=tiles_per,
                          valid_rows=Mg, needs_mask=needs_mask),
        out_shape=jax.ShapeDtypeStruct((n_split * R, L), jnp.float32),
        grid=(n_split, tiles_per),
        in_specs=[
            pl.BlockSpec((tm, L), lambda c, i: (c * tiles_per + i, 0)),
            pl.BlockSpec((tm, gp), lambda c, i: (c * tiles_per + i, 0)),
            pl.BlockSpec((gp, L), lambda c, i: (0, 0)),
        ],
        out_specs=pl.BlockSpec((R, L), lambda c, i: (c, 0)),
        compiler_params=pltpu.CompilerParams(
            dimension_semantics=("parallel", "arbitrary"),
            vmem_limit_bytes=_VMEM_LIMIT_BYTES),
        cost_estimate=pl.CostEstimate(
            flops=int(Mg * L * (2 * gp + 4)),
            transcendentals=0,
            bytes_accessed=int(Mg * L * itemsize + Mg * gp * 4
                               + gp * L * 4 + n_split * R * L * 4)),
    )(xp, mp_pad, onehot)

    stats = stats_raw.reshape(n_split, R, L).sum(axis=0)

    # ---- tiny [F]-sized stats math + folded affine (plain XLA) --------------
    sum_x = stats[0].reshape(g, F).sum(axis=0)
    sum_mx = stats[1].reshape(g, F).sum(axis=0)
    sum_mx2 = stats[2].reshape(g, F).sum(axis=0)

    denom = eps + mask_sum       # mask_sum == 0 blows up exactly like the PyTorch module.
    mean = sum_x / denom
    var = (sum_mx2 - 2.0 * mean * sum_mx + mean * mean * mask_sum) / denom
    rstd = jax.lax.rsqrt(var + eps)
    scale = rstd * alpha.astype(jnp.float32)
    bias = beta.astype(jnp.float32) - mean * scale
    scale_p = jnp.tile(scale, (g,)).reshape(1, L)
    bias_p = jnp.tile(bias, (g,)).reshape(1, L)

    # ---- pass 2: out = (x*scale + bias) * mask, streamed tile-by-tile -------
    out_p = pl.pallas_call(
        _norm_kernel,
        out_shape=jax.ShapeDtypeStruct((Mg, L), x_dtype),
        grid=(n_tiles,),
        in_specs=[
            pl.BlockSpec((tm, L), lambda i: (i, 0)),
            pl.BlockSpec((tm, gp), lambda i: (i, 0)),
            pl.BlockSpec((gp, L), lambda i: (0, 0)),
            pl.BlockSpec((1, L), lambda i: (0, 0)),
            pl.BlockSpec((1, L), lambda i: (0, 0)),
        ],
        out_specs=pl.BlockSpec((tm, L), lambda i: (i, 0)),
        compiler_params=pltpu.CompilerParams(
            dimension_semantics=("parallel",),
            vmem_limit_bytes=_VMEM_LIMIT_BYTES),
        cost_estimate=pl.CostEstimate(
            flops=int(Mg * L * (2 * gp + 3)),
            transcendentals=0,
            bytes_accessed=int(2 * Mg * L * itemsize + Mg * gp * 4 + gp * L * 4 + 2 * L * 4)),
    )(xp, mp_pad, onehot, scale_p, bias_p)

    return out_p.reshape(Mg * g, F)[:M].reshape(B, N, F)


def _reference(x, mask, alpha, beta):
    """Pure-JAX reference mirroring the PyTorch module."""
    mask1 = mask[:, :, None]
    mask_sum = jnp.sum(mask)
    mean = jnp.sum(x, axis=(0, 1), keepdims=True) / (EPS + mask_sum)
    temp = (x - mean) ** 2 * mask1
    var = jnp.sum(temp, axis=(0, 1), keepdims=True) / (EPS + mask_sum)
    rstd = jax.lax.rsqrt(var + EPS)
    xn = (x - mean) * rstd
    return (xn * alpha + beta) * mask1


if __name__ == "__main__":
    key = jax.random.PRNGKey(0)
    B, N, F = 2, 8, 32

    kx, km = jax.random.split(key)
    x = jax.random.normal(kx, (B, N, F), dtype=jnp.float32)
    # Deterministic binary mask with some zeros (padded nodes).
    mask = (jax.random.uniform(km, (B, N)) > 0.3).astype(jnp.float32)

    # Parameters as in __init__: alpha=ones, beta=zeros.
    alpha = jnp.ones((F,), dtype=jnp.float32)
    beta = jnp.zeros((F,), dtype=jnp.float32)

    ref = _reference(x, mask, alpha, beta)

    # f32 path (faithful to the PyTorch forward; recommended on v5e).
    fn = jax.jit(masked_batchnorm)
    out = jax.block_until_ready(fn(x, mask, alpha, beta))
    assert out.shape == (B, N, F)
    assert jnp.allclose(out, ref, atol=1e-4, rtol=1e-4), "f32 kernel mismatch vs reference"

    # bf16 streaming path: caller supplies bf16 x (no wrapper-side pre-cast);
    # statistics still accumulate in f32.  Recommended on v6e/v7x only.
    out_bf16 = jax.block_until_ready(fn(x.astype(jnp.bfloat16), mask, alpha, beta))
    assert out_bf16.dtype == jnp.bfloat16
    assert jnp.allclose(out_bf16.astype(jnp.float32), ref, atol=5e-2, rtol=5e-2), \
        "bf16 kernel mismatch vs reference"

    print("KERNEL_OK")
</pallas_src>

<mosaic_0001>
module attributes {stable_mosaic.version = 11 : i64} {
  func.func @_stats_kernel(%arg0: i32, %arg1: i32, %arg2: memref<8x128xf32, #tpu.memory_space<vmem>>, %arg3: memref<8x8xf32, #tpu.memory_space<vmem>>, %arg4: memref<8x128xf32, #tpu.memory_space<vmem>>, %arg5: memref<8x128xf32, #tpu.memory_space<vmem>>) attributes {dimension_semantics = [#tpu.dimension_semantics<parallel>, #tpu.dimension_semantics<arbitrary>], iteration_bounds = array<i64: 1, 1>, scalar_prefetch = 0 : i64, scratch_operands = 0 : i64, tpu.core_type = #tpu.core_type<tc>, window_params = [{transform_indices = @transform_0, window_bounds = array<i64: 8, 128>}, {transform_indices = @transform_1, window_bounds = array<i64: 8, 8>}, {pipeline_mode = #tpu.pipeline_mode<synchronous>, transform_indices = @transform_2, window_bounds = array<i64: 8, 128>}, {transform_indices = @transform_3, window_bounds = array<i64: 8, 128>}]} {
    %c0_i32 = arith.constant 0 : i32
    %0 = arith.cmpi eq, %arg1, %c0_i32 : i32
    %1 = arith.extui %0 : i1 to i32
    %c0_i32_0 = arith.constant 0 : i32
    %2 = arith.cmpi ne, %1, %c0_i32_0 : i32
    scf.if %2 {
      %cst_19 = arith.constant 0.000000e+00 : f32
      %24 = vector.broadcast %cst_19 : f32 to vector<8x128xf32>
      %c0_20 = arith.constant 0 : index
      %c0_21 = arith.constant 0 : index
      %25 = vector.load %arg5[%c0_20, %c0_21] : memref<8x128xf32, #tpu.memory_space<vmem>>, vector<8x128xf32>
      tpu.vector_store %arg5[%c0_20, %c0_21], %24 {strides = array<i32>} : memref<8x128xf32, #tpu.memory_space<vmem>>, vector<8x128xf32>,
    } else {
    }
    %c0 = arith.constant 0 : index
    %c0_1 = arith.constant 0 : index
    %3 = vector.load %arg2[%c0, %c0_1] : memref<8x128xf32, #tpu.memory_space<vmem>>, vector<8x128xf32>
    %c0_2 = arith.constant 0 : index
    %c0_3 = arith.constant 0 : index
    %4 = vector.load %arg3[%c0_2, %c0_3] : memref<8x8xf32, #tpu.memory_space<vmem>>, vector<8x8xf32>
    %c0_4 = arith.constant 0 : index
    %c0_5 = arith.constant 0 : index
    %5 = vector.load %arg4[%c0_4, %c0_5] : memref<8x128xf32, #tpu.memory_space<vmem>>, vector<8x128xf32>
    %cst = arith.constant dense<0.000000e+00> : vector<8x128xf32>
    %6 = tpu.matmul %4, %5, %cst {dimension_numbers = #tpu.dot_dimension_numbers<[1], [0], [0], [1], [0, 0, 1, 1], [], []>} : vector<8x8xf32>, vector<8x128xf32>, vector<8x128xf32> -> vector<8x128xf32>
    %7 = arith.mulf %3, %6 : vector<8x128xf32>
    %c0_6 = arith.constant 0 : index
    %c0_7 = arith.constant 0 : index
    %8 = vector.load %arg5[%c0_6, %c0_7] : memref<8x128xf32, #tpu.memory_space<vmem>>, vector<1x128xf32>
    %cst_8 = arith.constant dense<0.000000e+00> : vector<128xf32>
    %9 = vector.multi_reduction <add>, %3, %cst_8 [0] : vector<8x128xf32> to vector<128xf32>
    %10 = vector.shape_cast %9 : vector<128xf32> to vector<1x128xf32>
    %11 = arith.addf %8, %10 : vector<1x128xf32>
    %c0_9 = arith.constant 0 : index
    %c0_10 = arith.constant 0 : index
    %12 = vector.load %arg5[%c0_9, %c0_10] : memref<8x128xf32, #tpu.memory_space<vmem>>, vector<1x128xf32>
    tpu.vector_store %arg5[%c0_9, %c0_10], %11 {strides = array<i32>} : memref<8x128xf32, #tpu.memory_space<vmem>>, vector<1x128xf32>,
    %c1 = arith.constant 1 : index
    %c0_11 = arith.constant 0 : index
    %13 = vector.load %arg5[%c1, %c0_11] : memref<8x128xf32, #tpu.memory_space<vmem>>, vector<1x128xf32>
    %cst_12 = arith.constant dense<0.000000e+00> : vector<128xf32>
    %14 = vector.multi_reduction <add>, %7, %cst_12 [0] : vector<8x128xf32> to vector<128xf32>
    %15 = vector.shape_cast %14 : vector<128xf32> to vector<1x128xf32>
    %16 = arith.addf %13, %15 : vector<1x128xf32>
    %c1_13 = arith.constant 1 : index
    %c0_14 = arith.constant 0 : index
    %17 = vector.load %arg5[%c1_13, %c0_14] : memref<8x128xf32, #tpu.memory_space<vmem>>, vector<1x128xf32>
    tpu.vector_store %arg5[%c1_13, %c0_14], %16 {strides = array<i32>} : memref<8x128xf32, #tpu.memory_space<vmem>>, vector<1x128xf32>,
    %c2 = arith.constant 2 : index
    %c0_15 = arith.constant 0 : index
    %18 = vector.load %arg5[%c2, %c0_15] : memref<8x128xf32, #tpu.memory_space<vmem>>, vector<1x128xf32>
    %19 = arith.mulf %7, %3 : vector<8x128xf32>
    %cst_16 = arith.constant dense<0.000000e+00> : vector<128xf32>
    %20 = vector.multi_reduction <add>, %19, %cst_16 [0] : vector<8x128xf32> to vector<128xf32>
    %21 = vector.shape_cast %20 : vector<128xf32> to vector<1x128xf32>
    %22 = arith.addf %18, %21 : vector<1x128xf32>
    %c2_17 = arith.constant 2 : index
    %c0_18 = arith.constant 0 : index
    %23 = vector.load %arg5[%c2_17, %c0_18] : memref<8x128xf32, #tpu.memory_space<vmem>>, vector<1x128xf32>
    tpu.vector_store %arg5[%c2_17, %c0_18], %22 {strides = array<i32>} : memref<8x128xf32, #tpu.memory_space<vmem>>, vector<1x128xf32>,
    return
  }
  func.func @transform_0(%arg0: i32, %arg1: i32) -> (i32, i32) {
    %c1_i32 = arith.constant 1 : i32
    %0 = arith.muli %arg0, %c1_i32 : i32
    %1 = arith.addi %0, %arg1 : i32
    %c0_i32 = arith.constant 0 : i32
    %c0_i32_0 = arith.constant 0 : i32
    return %1, %c0_i32 : i32, i32
  }
  func.func @transform_1(%arg0: i32, %arg1: i32) -> (i32, i32) {
    %c1_i32 = arith.constant 1 : i32
    %0 = arith.muli %arg0, %c1_i32 : i32
    %1 = arith.addi %0, %arg1 : i32
    %c0_i32 = arith.constant 0 : i32
    %c0_i32_0 = arith.constant 0 : i32
    return %1, %c0_i32 : i32, i32
  }
  func.func @transform_2(%arg0: i32, %arg1: i32) -> (i32, i32) {
    %c0_i32 = arith.constant 0 : i32
    %c0_i32_0 = arith.constant 0 : i32
    %c0_i32_1 = arith.constant 0 : i32
    return %c0_i32, %c0_i32_0 : i32, i32
  }
  func.func @transform_3(%arg0: i32, %arg1: i32) -> (i32, i32) {
    %c0_i32 = arith.constant 0 : i32
    %c0_i32_0 = arith.constant 0 : i32
    return %arg0, %c0_i32 : i32, i32
  }
}

module attributes {stable_mosaic.version = 11 : i64} {
  func.func @_norm_kernel(%arg0: i32, %arg1: memref<8x128xf32, #tpu.memory_space<vmem>>, %arg2: memref<8x8xf32, #tpu.memory_space<vmem>>, %arg3: memref<8x128xf32, #tpu.memory_space<vmem>>, %arg4: memref<1x128xf32, #tpu.memory_space<vmem>>, %arg5: memref<1x128xf32, #tpu.memory_space<vmem>>, %arg6: memref<8x128xf32, #tpu.memory_space<vmem>>) attributes {dimension_semantics = [#tpu.dimension_semantics<parallel>], iteration_bounds = array<i64: 1>, scalar_prefetch = 0 : i64, scratch_operands = 0 : i64, tpu.core_type = #tpu.core_type<tc>, window_params = [{transform_indices = @transform_0, window_bounds = array<i64: 8, 128>}, {transform_indices = @transform_1, window_bounds = array<i64: 8, 8>}, {pipeline_mode = #tpu.pipeline_mode<synchronous>, transform_indices = @transform_2, window_bounds = array<i64: 8, 128>}, {pipeline_mode = #tpu.pipeline_mode<synchronous>, transform_indices = @transform_3, window_bounds = array<i64: 1, 128>}, {pipeline_mode = #tpu.pipeline_mode<synchronous>, transform_indices = @transform_4, window_bounds = array<i64: 1, 128>}, {transform_indices = @transform_5, window_bounds = array<i64: 8, 128>}]} {
    %c0 = arith.constant 0 : index
    %c0_0 = arith.constant 0 : index
    %0 = vector.load %arg1[%c0, %c0_0] : memref<8x128xf32, #tpu.memory_space<vmem>>, vector<8x128xf32>
    %c0_1 = arith.constant 0 : index
    %c0_2 = arith.constant 0 : index
    %1 = vector.load %arg2[%c0_1, %c0_2] : memref<8x8xf32, #tpu.memory_space<vmem>>, vector<8x8xf32>
    %c0_3 = arith.constant 0 : index
    %c0_4 = arith.constant 0 : index
    %2 = vector.load %arg3[%c0_3, %c0_4] : memref<8x128xf32, #tpu.memory_space<vmem>>, vector<8x128xf32>
    %cst = arith.constant dense<0.000000e+00> : vector<8x128xf32>
    %3 = tpu.matmul %1, %2, %cst {dimension_numbers = #tpu.dot_dimension_numbers<[1], [0], [0], [1], [0, 0, 1, 1], [], []>} : vector<8x8xf32>, vector<8x128xf32>, vector<8x128xf32> -> vector<8x128xf32>
    %c0_5 = arith.constant 0 : index
    %c0_6 = arith.constant 0 : index
    %4 = vector.load %arg4[%c0_5, %c0_6] : memref<1x128xf32, #tpu.memory_space<vmem>>, vector<1x128xf32>
    %5 = vector.broadcast %4 : vector<1x128xf32> to vector<8x128xf32>
    %6 = arith.mulf %0, %5 : vector<8x128xf32>
    %c0_7 = arith.constant 0 : index
    %c0_8 = arith.constant 0 : index
    %7 = vector.load %arg5[%c0_7, %c0_8] : memref<1x128xf32, #tpu.memory_space<vmem>>, vector<1x128xf32>
    %8 = vector.broadcast %7 : vector<1x128xf32> to vector<8x128xf32>
    %9 = arith.addf %6, %8 : vector<8x128xf32>
    %10 = arith.mulf %9, %3 : vector<8x128xf32>
    %c0_9 = arith.constant 0 : index
    %c0_10 = arith.constant 0 : index
    %11 = vector.load %arg6[%c0_9, %c0_10] : memref<8x128xf32, #tpu.memory_space<vmem>>, vector<8x128xf32>
    tpu.vector_store %arg6[%c0_9, %c0_10], %10 {strides = array<i32>} : memref<8x128xf32, #tpu.memory_space<vmem>>, vector<8x128xf32>,
    return
  }
  func.func @transform_0(%arg0: i32) -> (i32, i32) {
    %c0_i32 = arith.constant 0 : i32
    %c0_i32_0 = arith.constant 0 : i32
    return %arg0, %c0_i32 : i32, i32
  }
  func.func @transform_1(%arg0: i32) -> (i32, i32) {
    %c0_i32 = arith.constant 0 : i32
    %c0_i32_0 = arith.constant 0 : i32
    return %arg0, %c0_i32 : i32, i32
  }
  func.func @transform_2(%arg0: i32) -> (i32, i32) {
    %c0_i32 = arith.constant 0 : i32
    %c0_i32_0 = arith.constant 0 : i32
    %c0_i32_1 = arith.constant 0 : i32
    return %c0_i32, %c0_i32_0 : i32, i32
  }
  func.func @transform_3(%arg0: i32) -> (i32, i32) {
    %c0_i32 = arith.constant 0 : i32
    %c0_i32_0 = arith.constant 0 : i32
    %c0_i32_1 = arith.constant 0 : i32
    return %c0_i32, %c0_i32_0 : i32, i32
  }
  func.func @transform_4(%arg0: i32) -> (i32, i32) {
    %c0_i32 = arith.constant 0 : i32
    %c0_i32_0 = arith.constant 0 : i32
    %c0_i32_1 = arith.constant 0 : i32
    return %c0_i32, %c0_i32_0 : i32, i32
  }
  func.func @transform_5(%arg0: i32) -> (i32, i32) {
    %c0_i32 = arith.constant 0 : i32
    %c0_i32_0 = arith.constant 0 : i32
    return %arg0, %c0_i32 : i32, i32
  }
}

</mosaic_0001>

<bundles_post_ra>
// kernel: squeeze.3
= control target key start
LH: loop header
LB: loop body
LE: loop exit
PB: predicated region body
PF: predicated region fallthrough
CT: control target
= control target key end

     0   :  { %s37_s8 = smov 32   ;;  %vm7_vm0 = vcmask 261120   ;;  %s38_s9 = smov 64   ;;  %s55_s0 = inlined_call_operand.vmem [shape: f32[128], index: 0, kind: input, shape index: {}]   ;;  %s56_s1 = inlined_call_operand.vmem [shape: f32[4,32], index: 1, kind: output, shape index: {}]  }
   0x1   :  { %v4_v0 = vld [vmem:[%s55_s0] sm:$0x1]  ;;  %s36_s0 = smov 96  }
   0x2   :  { %5 = vst [vmem:[#allocation1] sm:$0x1] %v4_v0 }
   0x9   :  { %v9_v1 = vld [vmem:[#allocation1] sm:$0x1]  }
   0xa   :  { %v21_v2 = vld [vmem:[#allocation1] sm:$0x1]   ;;  %10 = vrot.lane.b32.xlu0 %v9_v1, %s36_s0 }
   0xb   :  { %22 = vrot.lane.b32.xlu1 %v21_v2, %s37_s8  ;;  %v6_v3 = vld [vmem:[#allocation1] sm:$0x1]  }
   0xc   :  { %v15_v4 = vld [vmem:[#allocation1] sm:$0x1]   ;;  %8 = vst.msk [vmem:[#allocation0] sm:$0x1] %vm7_vm0, %v6_v3  }
   0xe   :  { %16 = vrot.lane.b32.xlu0 %v15_v4, %s38_s9 }
  0x7c   :  { %v11_v5 = vpop.permute.xlu0 %10  }
  0x7d   :  { %v23_v6 = vpop.permute.xlu1 %22   ;;  %14 = vst.msk [vmem:[#allocation0 + $0x1] sm:$0x1] %vm7_vm0, %v11_v5  }
  0x7e   :  { %26 = vst.msk [vmem:[#allocation0 + $0x3] sm:$0x1] %vm7_vm0, %v23_v6  }
  0x80   :  { %v17_v7 = vpop.permute.xlu0 %16  }
  0x81   :  { %20 = vst.msk [vmem:[#allocation0 + $0x2] sm:$0x1] %vm7_vm0, %v17_v7  }
  0x88   :  { %v30_v8 = vld [vmem:[#allocation0] sm:$0xf] }
  0x89   :  { %32 = vst [vmem:[%s56_s1] sm:$0xf] %v30_v8 }

// kernel: tile.13
= control target key start
LH: loop header
LB: loop body
LE: loop exit
PB: predicated region body
PF: predicated region fallthrough
CT: control target
= control target key end

     0   :  { %s22_s0 = inlined_call_operand.vmem [shape: f32[32], index: 0, kind: input, shape index: {}]   ;;  %s23_s1 = inlined_call_operand.vmem [shape: f32[4,32], index: 1, kind: output, shape index: {}]  }
   0x1   :  { %v4_v0 = vld [vmem:[%s22_s0] ss:$0 sm:$0xff] }
   0x2   :  { %5 = vst [vmem:[%s23_s1] sm:$0xf] %v4_v0 }

// kernel: tile.14
= control target key start
LH: loop header
LB: loop body
LE: loop exit
PB: predicated region body
PF: predicated region fallthrough
CT: control target
= control target key end

     0   :  { %vm7_vm0 = vcmask 261120   ;;  %s37_s8 = smov 32   ;;  %s38_s9 = smov 64   ;;  %vm13_vm1 = vcmask 1048320   ;;  %vm19_vm2 = vcmask 785920   ;;  %vm25_vm3 = vcmask 523520   ;;  %s55_s0 = inlined_call_operand.vmem [shape: f32[4,32], index: 0, kind: input, shape index: {}]   ;;  %s56_s1 = inlined_call_operand.vmem [shape: f32[1,128], index: 1, kind: output, shape index: {}]  }
   0x1   :  { %v4_v0 = vld [vmem:[%s55_s0] sm:$0xf]  ;;  %s36_s0 = smov 96  }
   0x2   :  { %5 = vst [vmem:[#allocation1] sm:$0xf] %v4_v0 }
   0x9   :  { %v10_v1 = vld [vmem:[#allocation1 + $0x3] sm:$0x1]   ;;  %v22_v2 = vld [vmem:[#allocation1 + $0x1] sm:$0x1]   ;;  %v6_v3 = vld [vmem:[#allocation1] sm:$0x1]  }
   0xa   :  { %11 = vrot.lane.b32.xlu0 %v10_v1, %s36_s0  ;;  %23 = vrot.lane.b32.xlu1 %v22_v2, %s37_s8  ;;  %v16_v4 = vld [vmem:[#allocation1 + $0x2] sm:$0x1]   ;;  %8 = vst.msk [vmem:[#allocation0] sm:$0x1] %vm7_vm0, %v6_v3  }
   0xe   :  { %17 = vrot.lane.b32.xlu0 %v16_v4, %s38_s9 }
  0x7c   :  { %v12_v5 = vpop.permute.xlu0 %11   ;;  %v24_v6 = vpop.permute.xlu1 %23  }
  0x7d   :  { %14 = vst.msk [vmem:[#allocation0] sm:$0x1] %vm13_vm1, %v12_v5  }
  0x80   :  { %v18_v7 = vpop.permute.xlu0 %17  }
  0x81   :  { %20 = vst.msk [vmem:[#allocation0] sm:$0x1] %vm19_vm2, %v18_v7  }
  0x82   :  { %26 = vst.msk [vmem:[#allocation0] sm:$0x1] %vm25_vm3, %v24_v6  }
  0x89   :  { %v30_v8 = vld [vmem:[#allocation0] sm:$0x1] }
  0x8a   :  { %32 = vst [vmem:[%s56_s1] sm:$0x1] %v30_v8 }

// kernel: masked_batchnorm.3
= control target key start
LH: loop header
LB: loop body
LE: loop exit
PB: predicated region body
PF: predicated region fallthrough
CT: control target
= control target key end

     0   :  { %vm23_vm0 = vcmask 64512   ;;  %v131_v0 = vmov 0.0   ;;  %vm132_vm1 = vmmov 0   ;;  %s181_s2 = inlined_call_operand.vmem [shape: f32[8,128], index: 2, kind: input, shape index: {}]   ;;  %s182_s1 = inlined_call_operand.vmem [shape: f32[8,8], index: 1, kind: input, shape index: {}]   ;;  %s183_s0 = inlined_call_operand.vmem [shape: f32[8,128], index: 0, kind: input, shape index: {}]   ;;  %s184_s3 = inlined_call_operand.vmem [shape: f32[1,128], index: 3, kind: input, shape index: {}]   ;;  %s185_s4 = inlined_call_operand.vmem [shape: f32[1,128], index: 4, kind: input, shape index: {}]   ;;  %s186_s5 = inlined_call_operand.vmem [shape: f32[8,128], index: 5, kind: output, shape index: {}]  }
   0x1   :  { %124 = vmatprep.subr.mxu0 %v131_v0  ;;  %v22_v1 = vld [vmem:[%s181_s2] sm:$0xff]  ;;  %126 = vmatprep.mubr.msk.f32.mxu0 %vm132_vm1, %v131_v0 }
   0x2   :  { %v21_v2 = vld [vmem:[%s182_s1] sm:$0xff]  ;;  %125 = vmatpush3.msra.mxu0 %v22_v1 }
   0x3   :  { %127 = vmatmul.mubr.msk.f32.vlgmr.msra.gmra.mrb[0].mxu0 %vm23_vm0, %v21_v2  ;;  %v20_v3 = vld [vmem:[%s183_s0] sm:$0xff] }
   0x4   :  { %v120_v4 = vld [vmem:[%s184_s3] ss:$0 sm:$0xff] }
   0x5   :  { %v104_v5 = vmul.f32 %v120_v4, %v20_v3  ;;  %v121_v6 = vld [vmem:[%s185_s4] ss:$0 sm:$0xff] }
   0x7   :  { %v112_v7 = vadd.f32 %v121_v6, %v104_v5 }
  0xd6   :  { %v93_v8 = vpop.f32.mrb[0].mxu0 }
  0xd7   :  { %v113_v9 = vmul.f32 %v112_v7, %v93_v8  ;;  %v128_v10 = vpop.f32.mrb[1].mxu0 }
  0xd9   :  { %114 = vst [vmem:[%s186_s5] sm:$0xff] %v113_v9 }

// kernel: masked_batchnorm.2
= control target key start
LH: loop header
LB: loop body
LE: loop exit
PB: predicated region body
PF: predicated region fallthrough
CT: control target
= control target key end

     0   :  { %vm56_vm0 = vcmask 64512   ;;  %v185_v0 = vmov 0.0   ;;  %vm186_vm1 = vmmov 0   ;;  %s237_s3 = inlined_call_operand.vmem [shape: f32[8,128], index: 3, kind: output, shape index: {}]   ;;  %s238_s2 = inlined_call_operand.vmem [shape: f32[8,128], index: 2, kind: input, shape index: {}]   ;;  %s239_s1 = inlined_call_operand.vmem [shape: f32[8,8], index: 1, kind: input, shape index: {}]   ;;  %s240_s0 = inlined_call_operand.vmem [shape: f32[8,128], index: 0, kind: input, shape index: {}]  }
   0x1   :  { %52 = vst [vmem:[%s237_s3] sm:$0xff] %v185_v0  ;;  %178 = vmatprep.subr.mxu0 %v185_v0  ;;  %v55_v1 = vld [vmem:[%s238_s2] sm:$0xff]  ;;  %180 = vmatprep.mubr.msk.f32.mxu0 %vm186_vm1, %v185_v0 }
   0x2   :  { %v54_v2 = vld [vmem:[%s239_s1] sm:$0xff]  ;;  %179 = vmatpush3.msra.mxu0 %v55_v1 }
   0x3   :  { %181 = vmatmul.mubr.msk.f32.vlgmr.msra.gmra.mrb[0].mxu0 %vm56_vm0, %v54_v2  ;;  %v53_v3 = vld [vmem:[%s240_s0] sm:$0xff] }
   0x4   :  { %v132_v4 = vrot.slane %v53_v3, 4 }
   0x6   :  { %v133_v5 = vadd.f32 %v132_v4, %v53_v3 }
   0x8   :  { %v134_v6 = vrot.slane %v133_v5, 2  ;;  %v131_v9 = vld [vmem:[%s237_s3] sm:$0x1]  ;;  %v140_v25 = vld [vmem:[%s237_s3 + $0x1] sm:$0x1] }
   0x9   :  { %v149_v28 = vld [vmem:[%s237_s3 + $0x2] sm:$0x1] }
   0xa   :  { %v135_v7 = vadd.f32 %v134_v6, %v133_v5 }
   0xc   :  { %v136_v8 = vrot.slane %v135_v7, 1 }
   0xe   :  { %v137_v10 = vadd.f32 %v136_v8, %v135_v7 }
  0x10   :  { %v138_v11 = vadd.f32 %v137_v10, %v131_v9 }
  0x12   :  { %139 = vst [vmem:[%s237_s3] sm:$0x1] %v138_v11 }
  0xd6   :  { %v126_v12 = vpop.f32.mrb[0].mxu0 }
  0xd7   :  { %v130_v13 = vmul.f32 %v126_v12, %v53_v3  ;;  %v182_v14 = vpop.f32.mrb[1].mxu0 }
  0xd9   :  { %v141_v15 = vrot.slane %v130_v13, 4  ;;  %v150_v16 = vmul.f32 %v130_v13, %v53_v3 }
  0xdb   :  { %v142_v17 = vadd.f32 %v141_v15, %v130_v13  ;;  %v151_v18 = vrot.slane %v150_v16, 4 }
  0xdd   :  { %v143_v19 = vrot.slane %v142_v17, 2  ;;  %v152_v20 = vadd.f32 %v151_v18, %v150_v16 }
  0xdf   :  { %v144_v21 = vadd.f32 %v143_v19, %v142_v17  ;;  %v153_v22 = vrot.slane %v152_v20, 2 }
  0xe1   :  { %v145_v23 = vrot.slane %v144_v21, 1  ;;  %v154_v24 = vadd.f32 %v153_v22, %v152_v20 }
  0xe3   :  { %v146_v26 = vadd.f32 %v145_v23, %v144_v21  ;;  %v155_v27 = vrot.slane %v154_v24, 1 }
  0xe5   :  { %v147_v29 = vadd.f32 %v146_v26, %v140_v25  ;;  %v156_v30 = vadd.f32 %v155_v27, %v154_v24 }
  0xe7   :  { %148 = vst [vmem:[%s237_s3 + $0x1] sm:$0x1] %v147_v29  ;;  %v157_v31 = vadd.f32 %v156_v30, %v149_v28 }
  0xe9   :  { %158 = vst [vmem:[%s237_s3 + $0x2] sm:$0x1] %v157_v31 }

</bundles_post_ra>
